<compile_context>
chip_gen: v7x
topology: tpu7x:2x2x1
jax: 0.10.0
libtpu: 0.0.40
codegen_flags: <defaults>
</compile_context>

<pallas_src>
import jax
import jax.numpy as jnp
from jax.experimental import pallas as pl
from jax.experimental.pallas import tpu as pltpu

LANE = 128


def _round_up(n: int, m: int) -> int:
    return ((n + m - 1) // m) * m


# ---------------------------------------------------------------------------
# Kernel: full 6-layer MLP chain on one (TB, I) batch tile.
# Weight N dims are padded to 128 (lane-dense matmul results); intermediate
# activations are 128 wide with zeros in dead lanes.
# ---------------------------------------------------------------------------
def autoencoder_kernel(
    x_ref,                                                   # (TB, I)  bf16
    we0_ref, be0_ref, we1_ref, be1_ref, we2_ref, be2_ref,    # encoder (bf16 W, f32 b)
    wd0_ref, bd0_ref, wd1_ref, bd1_ref, wd2_ref, bd2_ref,    # decoder
    dec_ref,                                                 # (TB, I)  f32
    lat_ref,                                                 # (TB, L)  f32
):
    f32 = jnp.float32
    bf16 = jnp.bfloat16

    x = x_ref[...]                                           # bf16, unpadded K

    # ---- encoder ----
    h = jnp.dot(x, we0_ref[...], preferred_element_type=f32) + be0_ref[...]
    h = jnp.maximum(h, 0.0).astype(bf16)
    h = jnp.dot(h, we1_ref[...], preferred_element_type=f32) + be1_ref[...]
    h = jnp.maximum(h, 0.0).astype(bf16)
    latents = jnp.dot(h, we2_ref[...], preferred_element_type=f32) + be2_ref[...]

    # ---- decoder ----
    d = jnp.dot(latents.astype(bf16), wd0_ref[...], preferred_element_type=f32) + bd0_ref[...]
    d = jnp.maximum(d, 0.0).astype(bf16)
    d = jnp.dot(d, wd1_ref[...], preferred_element_type=f32) + bd1_ref[...]
    d = jnp.maximum(d, 0.0).astype(bf16)
    decoded = jnp.dot(d, wd2_ref[...], preferred_element_type=f32) + bd2_ref[...]

    # Unpadded outputs: take the live lanes only (static prefix slices).
    dec_ref[...] = decoded[:, : dec_ref.shape[1]].astype(dec_ref.dtype)
    lat_ref[...] = latents[:, : lat_ref.shape[1]].astype(lat_ref.dtype)


# ---------------------------------------------------------------------------
# Parameter construction (mimics nn.Linear init), kept in "math" (unpadded)
# [in, out] layout + padded/bf16 copies for the kernel.
# ---------------------------------------------------------------------------
def make_params(key, input_dim, latent_dim, layer_sizes=(64, 32)):
    """Deterministic init mimicking nn.Linear's U(-1/sqrt(in), 1/sqrt(in)).

    Returns 6 (w, b) pairs, w stored as [in, out] (torch weight transposed),
    b as [out]. Order: 3 encoder layers then 3 decoder layers.
    """
    sizes = [input_dim] + list(layer_sizes) + [latent_dim]
    enc_dims = list(zip(sizes[:-1], sizes[1:]))                 # encoder (in, out)
    dec_dims = [(o, i) for (i, o) in reversed(enc_dims)]        # mirrored decoder
    params = []
    for (fan_in, fan_out) in enc_dims + dec_dims:
        key, kw, kb = jax.random.split(key, 3)
        bound = 1.0 / jnp.sqrt(fan_in)
        w = jax.random.uniform(kw, (fan_in, fan_out), jnp.float32, -bound, bound)
        b = jax.random.uniform(kb, (fan_out,), jnp.float32, -bound, bound)
        params.append((w, b))
    return params


def pad_params_for_kernel(params):
    """Pad for the kernel:
      * N (output) dim -> multiple of 128 (lane-dense matmul results).
      * K (input) dim  -> multiple of 128 for layers 1..5 so it matches the
        128-wide activation of the previous layer; layer 0 keeps K = input_dim
        (matches the unpadded x; Mosaic sublane-pads K in VMEM for free).
    Weights -> bf16, biases -> f32 (1, Npad). Padding lanes/rows are zero."""
    padded = []
    for idx, (w, b) in enumerate(params):
        fi, fo = w.shape
        fip = fi if idx == 0 else _round_up(fi, LANE)
        fop = _round_up(fo, LANE)
        wp = jnp.zeros((fip, fop), jnp.float32).at[:fi, :fo].set(w).astype(jnp.bfloat16)
        bp = jnp.zeros((1, fop), jnp.float32).at[0, :fo].set(b)
        padded.append((wp, bp))
    return padded


# ---------------------------------------------------------------------------
# Wrapper
# ---------------------------------------------------------------------------
def autoencoder_forward(x, params, *, max_tb=4096):
    B, input_dim = x.shape
    latent_dim = params[2][0].shape[1]

    padded = pad_params_for_kernel(params)
    flat = []
    for (w, b) in padded:
        flat += [w, b]

    # Unpadded bf16 input (no host-side lane padding pass).
    xb = x.astype(jnp.bfloat16)

    # Batch tile: aim for >=2 grid steps (both TCs on v7x) when B > 8, capped
    # at max_tb; tiny batches use a single full-batch block.
    if B <= 8:
        TB = B
    else:
        TB = min(max_tb, max(8, _round_up(pl.cdiv(B, 2), 8)))
    grid = (pl.cdiv(B, TB),)

    out_shape = (
        jax.ShapeDtypeStruct((B, input_dim), jnp.float32),   # decoded
        jax.ShapeDtypeStruct((B, latent_dim), jnp.float32),  # latents
    )

    # x / outputs move with the batch grid; weights & biases stay resident.
    x_spec = pl.BlockSpec((TB, input_dim), lambda i: (i, 0))
    param_specs = [pl.BlockSpec(p.shape, lambda i: (0, 0)) for p in flat]
    out_specs = (
        pl.BlockSpec((TB, input_dim), lambda i: (i, 0)),
        pl.BlockSpec((TB, latent_dim), lambda i: (i, 0)),
    )

    # Advisory cost estimate (padded matmul sizes, bf16/f32 traffic).
    flops = 2 * B * sum(int(w.shape[0]) * int(w.shape[1]) for (w, _) in padded)
    bytes_accessed = (
        xb.size * 2
        + sum(int(w.size) * 2 + int(b.size) * 4 for (w, b) in padded)
        + B * (input_dim + latent_dim) * 4
    )

    decoded, latents = pl.pallas_call(
        autoencoder_kernel,
        out_shape=out_shape,
        grid=grid,
        in_specs=[x_spec] + param_specs,
        out_specs=out_specs,
        compiler_params=pltpu.CompilerParams(
            dimension_semantics=("parallel",),
            vmem_limit_bytes=32 * 1024 * 1024,
        ),
        cost_estimate=pl.CostEstimate(
            flops=flops, transcendentals=0, bytes_accessed=bytes_accessed
        ),
    )(xb, *flat)

    return decoded, latents


def reference_forward(x, params):
    """Pure-JAX f32 reference (matches the PyTorch module exactly)."""
    h = x
    for idx, (w, b) in enumerate(params[:3]):
        h = h @ w + b
        if idx != 2:
            h = jnp.maximum(h, 0.0)
    latents = h
    d = latents
    for idx, (w, b) in enumerate(params[3:]):
        d = d @ w + b
        if idx != 2:
            d = jnp.maximum(d, 0.0)
    return d, latents


if __name__ == "__main__":
    key = jax.random.PRNGKey(0)
    key, kx, kp = jax.random.split(key, 3)

    batch = 8
    input_dim = 16
    latent_dim = 8

    x = jax.random.normal(kx, (batch, input_dim), jnp.float32)
    params = make_params(kp, input_dim, latent_dim, layer_sizes=(64, 32))

    decoded, latents = autoencoder_forward(x, params)
    decoded = jax.block_until_ready(decoded)
    latents = jax.block_until_ready(latents)

    ref_decoded, ref_latents = reference_forward(x, params)
    assert decoded.shape == (batch, input_dim)
    assert latents.shape == (batch, latent_dim)
    # Kernel runs the matmuls in bf16 with f32 accumulation -> compare against
    # the f32 reference with a bf16-appropriate tolerance.
    assert jnp.allclose(decoded, ref_decoded, atol=1e-2, rtol=1e-2), (
        jnp.max(jnp.abs(decoded - ref_decoded)))
    assert jnp.allclose(latents, ref_latents, atol=1e-2, rtol=1e-2), (
        jnp.max(jnp.abs(latents - ref_latents)))

    print("KERNEL_OK")
</pallas_src>

<mosaic_0001>
module attributes {stable_mosaic.version = 11 : i64} {
  func.func @autoencoder_kernel(%arg0: i32, %arg1: memref<8x16xbf16, #tpu.memory_space<vmem>>, %arg2: memref<16x128xbf16, #tpu.memory_space<vmem>>, %arg3: memref<1x128xf32, #tpu.memory_space<vmem>>, %arg4: memref<128x128xbf16, #tpu.memory_space<vmem>>, %arg5: memref<1x128xf32, #tpu.memory_space<vmem>>, %arg6: memref<128x128xbf16, #tpu.memory_space<vmem>>, %arg7: memref<1x128xf32, #tpu.memory_space<vmem>>, %arg8: memref<128x128xbf16, #tpu.memory_space<vmem>>, %arg9: memref<1x128xf32, #tpu.memory_space<vmem>>, %arg10: memref<128x128xbf16, #tpu.memory_space<vmem>>, %arg11: memref<1x128xf32, #tpu.memory_space<vmem>>, %arg12: memref<128x128xbf16, #tpu.memory_space<vmem>>, %arg13: memref<1x128xf32, #tpu.memory_space<vmem>>, %arg14: memref<8x16xf32, #tpu.memory_space<vmem>>, %arg15: memref<8x8xf32, #tpu.memory_space<vmem>>) attributes {dimension_semantics = [#tpu.dimension_semantics<parallel>], iteration_bounds = array<i64: 1>, scalar_prefetch = 0 : i64, scratch_operands = 0 : i64, tpu.core_type = #tpu.core_type<tc>, window_params = [{transform_indices = @transform_0, window_bounds = array<i64: 8, 16>}, {pipeline_mode = #tpu.pipeline_mode<synchronous>, transform_indices = @transform_1, window_bounds = array<i64: 16, 128>}, {pipeline_mode = #tpu.pipeline_mode<synchronous>, transform_indices = @transform_2, window_bounds = array<i64: 1, 128>}, {pipeline_mode = #tpu.pipeline_mode<synchronous>, transform_indices = @transform_3, window_bounds = array<i64: 128, 128>}, {pipeline_mode = #tpu.pipeline_mode<synchronous>, transform_indices = @transform_4, window_bounds = array<i64: 1, 128>}, {pipeline_mode = #tpu.pipeline_mode<synchronous>, transform_indices = @transform_5, window_bounds = array<i64: 128, 128>}, {pipeline_mode = #tpu.pipeline_mode<synchronous>, transform_indices = @transform_6, window_bounds = array<i64: 1, 128>}, {pipeline_mode = #tpu.pipeline_mode<synchronous>, transform_indices = @transform_7, window_bounds = array<i64: 128, 128>}, {pipeline_mode = #tpu.pipeline_mode<synchronous>, transform_indices = @transform_8, window_bounds = array<i64: 1, 128>}, {pipeline_mode = #tpu.pipeline_mode<synchronous>, transform_indices = @transform_9, window_bounds = array<i64: 128, 128>}, {pipeline_mode = #tpu.pipeline_mode<synchronous>, transform_indices = @transform_10, window_bounds = array<i64: 1, 128>}, {pipeline_mode = #tpu.pipeline_mode<synchronous>, transform_indices = @transform_11, window_bounds = array<i64: 128, 128>}, {pipeline_mode = #tpu.pipeline_mode<synchronous>, transform_indices = @transform_12, window_bounds = array<i64: 1, 128>}, {transform_indices = @transform_13, window_bounds = array<i64: 8, 16>}, {transform_indices = @transform_14, window_bounds = array<i64: 8, 8>}]} {
    %c0 = arith.constant 0 : index
    %c0_0 = arith.constant 0 : index
    %0 = vector.load %arg1[%c0, %c0_0] : memref<8x16xbf16, #tpu.memory_space<vmem>>, vector<8x16xbf16>
    %c0_1 = arith.constant 0 : index
    %c0_2 = arith.constant 0 : index
    %1 = vector.load %arg2[%c0_1, %c0_2] : memref<16x128xbf16, #tpu.memory_space<vmem>>, vector<16x128xbf16>
    %cst = arith.constant dense<0.000000e+00> : vector<8x128xf32>
    %2 = tpu.matmul %0, %1, %cst {dimension_numbers = #tpu.dot_dimension_numbers<[1], [0], [0], [1], [0, 0, 1, 1], [], []>} : vector<8x16xbf16>, vector<16x128xbf16>, vector<8x128xf32> -> vector<8x128xf32>
    %c0_3 = arith.constant 0 : index
    %c0_4 = arith.constant 0 : index
    %3 = vector.load %arg3[%c0_3, %c0_4] : memref<1x128xf32, #tpu.memory_space<vmem>>, vector<1x128xf32>
    %4 = vector.broadcast %3 : vector<1x128xf32> to vector<8x128xf32>
    %5 = arith.addf %2, %4 : vector<8x128xf32>
    %cst_5 = arith.constant 0.000000e+00 : f32
    %6 = vector.broadcast %cst_5 : f32 to vector<8x128xf32>
    %7 = arith.maximumf %5, %6 : vector<8x128xf32>
    %8 = arith.truncf %7 : vector<8x128xf32> to vector<8x128xbf16>
    %c0_6 = arith.constant 0 : index
    %c0_7 = arith.constant 0 : index
    %9 = vector.load %arg4[%c0_6, %c0_7] : memref<128x128xbf16, #tpu.memory_space<vmem>>, vector<128x128xbf16>
    %cst_8 = arith.constant dense<0.000000e+00> : vector<8x128xf32>
    %10 = tpu.matmul %8, %9, %cst_8 {dimension_numbers = #tpu.dot_dimension_numbers<[1], [0], [0], [1], [0, 0, 1, 1], [], []>} : vector<8x128xbf16>, vector<128x128xbf16>, vector<8x128xf32> -> vector<8x128xf32>
    %c0_9 = arith.constant 0 : index
    %c0_10 = arith.constant 0 : index
    %11 = vector.load %arg5[%c0_9, %c0_10] : memref<1x128xf32, #tpu.memory_space<vmem>>, vector<1x128xf32>
    %12 = vector.broadcast %11 : vector<1x128xf32> to vector<8x128xf32>
    %13 = arith.addf %10, %12 : vector<8x128xf32>
    %cst_11 = arith.constant 0.000000e+00 : f32
    %14 = vector.broadcast %cst_11 : f32 to vector<8x128xf32>
    %15 = arith.maximumf %13, %14 : vector<8x128xf32>
    %16 = arith.truncf %15 : vector<8x128xf32> to vector<8x128xbf16>
    %c0_12 = arith.constant 0 : index
    %c0_13 = arith.constant 0 : index
    %17 = vector.load %arg6[%c0_12, %c0_13] : memref<128x128xbf16, #tpu.memory_space<vmem>>, vector<128x128xbf16>
    %cst_14 = arith.constant dense<0.000000e+00> : vector<8x128xf32>
    %18 = tpu.matmul %16, %17, %cst_14 {dimension_numbers = #tpu.dot_dimension_numbers<[1], [0], [0], [1], [0, 0, 1, 1], [], []>} : vector<8x128xbf16>, vector<128x128xbf16>, vector<8x128xf32> -> vector<8x128xf32>
    %c0_15 = arith.constant 0 : index
    %c0_16 = arith.constant 0 : index
    %19 = vector.load %arg7[%c0_15, %c0_16] : memref<1x128xf32, #tpu.memory_space<vmem>>, vector<1x128xf32>
    %20 = vector.broadcast %19 : vector<1x128xf32> to vector<8x128xf32>
    %21 = arith.addf %18, %20 : vector<8x128xf32>
    %22 = arith.truncf %21 : vector<8x128xf32> to vector<8x128xbf16>
    %c0_17 = arith.constant 0 : index
    %c0_18 = arith.constant 0 : index
    %23 = vector.load %arg8[%c0_17, %c0_18] : memref<128x128xbf16, #tpu.memory_space<vmem>>, vector<128x128xbf16>
    %cst_19 = arith.constant dense<0.000000e+00> : vector<8x128xf32>
    %24 = tpu.matmul %22, %23, %cst_19 {dimension_numbers = #tpu.dot_dimension_numbers<[1], [0], [0], [1], [0, 0, 1, 1], [], []>} : vector<8x128xbf16>, vector<128x128xbf16>, vector<8x128xf32> -> vector<8x128xf32>
    %c0_20 = arith.constant 0 : index
    %c0_21 = arith.constant 0 : index
    %25 = vector.load %arg9[%c0_20, %c0_21] : memref<1x128xf32, #tpu.memory_space<vmem>>, vector<1x128xf32>
    %26 = vector.broadcast %25 : vector<1x128xf32> to vector<8x128xf32>
    %27 = arith.addf %24, %26 : vector<8x128xf32>
    %cst_22 = arith.constant 0.000000e+00 : f32
    %28 = vector.broadcast %cst_22 : f32 to vector<8x128xf32>
    %29 = arith.maximumf %27, %28 : vector<8x128xf32>
    %30 = arith.truncf %29 : vector<8x128xf32> to vector<8x128xbf16>
    %c0_23 = arith.constant 0 : index
    %c0_24 = arith.constant 0 : index
    %31 = vector.load %arg10[%c0_23, %c0_24] : memref<128x128xbf16, #tpu.memory_space<vmem>>, vector<128x128xbf16>
    %cst_25 = arith.constant dense<0.000000e+00> : vector<8x128xf32>
    %32 = tpu.matmul %30, %31, %cst_25 {dimension_numbers = #tpu.dot_dimension_numbers<[1], [0], [0], [1], [0, 0, 1, 1], [], []>} : vector<8x128xbf16>, vector<128x128xbf16>, vector<8x128xf32> -> vector<8x128xf32>
    %c0_26 = arith.constant 0 : index
    %c0_27 = arith.constant 0 : index
    %33 = vector.load %arg11[%c0_26, %c0_27] : memref<1x128xf32, #tpu.memory_space<vmem>>, vector<1x128xf32>
    %34 = vector.broadcast %33 : vector<1x128xf32> to vector<8x128xf32>
    %35 = arith.addf %32, %34 : vector<8x128xf32>
    %cst_28 = arith.constant 0.000000e+00 : f32
    %36 = vector.broadcast %cst_28 : f32 to vector<8x128xf32>
    %37 = arith.maximumf %35, %36 : vector<8x128xf32>
    %38 = arith.truncf %37 : vector<8x128xf32> to vector<8x128xbf16>
    %c0_29 = arith.constant 0 : index
    %c0_30 = arith.constant 0 : index
    %39 = vector.load %arg12[%c0_29, %c0_30] : memref<128x128xbf16, #tpu.memory_space<vmem>>, vector<128x128xbf16>
    %cst_31 = arith.constant dense<0.000000e+00> : vector<8x128xf32>
    %40 = tpu.matmul %38, %39, %cst_31 {dimension_numbers = #tpu.dot_dimension_numbers<[1], [0], [0], [1], [0, 0, 1, 1], [], []>} : vector<8x128xbf16>, vector<128x128xbf16>, vector<8x128xf32> -> vector<8x128xf32>
    %c0_32 = arith.constant 0 : index
    %c0_33 = arith.constant 0 : index
    %41 = vector.load %arg13[%c0_32, %c0_33] : memref<1x128xf32, #tpu.memory_space<vmem>>, vector<1x128xf32>
    %42 = vector.broadcast %41 : vector<1x128xf32> to vector<8x128xf32>
    %43 = arith.addf %40, %42 : vector<8x128xf32>
    %44 = vector.extract_strided_slice %43 {offsets = [0, 0], sizes = [8, 16], strides = [1, 1]} : vector<8x128xf32> to vector<8x16xf32>
    %c0_34 = arith.constant 0 : index
    %c0_35 = arith.constant 0 : index
    %45 = vector.load %arg14[%c0_34, %c0_35] : memref<8x16xf32, #tpu.memory_space<vmem>>, vector<8x16xf32>
    tpu.vector_store %arg14[%c0_34, %c0_35], %44 {strides = array<i32>} : memref<8x16xf32, #tpu.memory_space<vmem>>, vector<8x16xf32>,
    %46 = vector.extract_strided_slice %21 {offsets = [0, 0], sizes = [8, 8], strides = [1, 1]} : vector<8x128xf32> to vector<8x8xf32>
    %c0_36 = arith.constant 0 : index
    %c0_37 = arith.constant 0 : index
    %47 = vector.load %arg15[%c0_36, %c0_37] : memref<8x8xf32, #tpu.memory_space<vmem>>, vector<8x8xf32>
    tpu.vector_store %arg15[%c0_36, %c0_37], %46 {strides = array<i32>} : memref<8x8xf32, #tpu.memory_space<vmem>>, vector<8x8xf32>,
    return
  }
  func.func @transform_0(%arg0: i32) -> (i32, i32) {
    %c0_i32 = arith.constant 0 : i32
    %c0_i32_0 = arith.constant 0 : i32
    return %arg0, %c0_i32 : i32, i32
  }
  func.func @transform_1(%arg0: i32) -> (i32, i32) {
    %c0_i32 = arith.constant 0 : i32
    %c0_i32_0 = arith.constant 0 : i32
    %c0_i32_1 = arith.constant 0 : i32
    return %c0_i32, %c0_i32_0 : i32, i32
  }
  func.func @transform_2(%arg0: i32) -> (i32, i32) {
    %c0_i32 = arith.constant 0 : i32
    %c0_i32_0 = arith.constant 0 : i32
    %c0_i32_1 = arith.constant 0 : i32
    return %c0_i32, %c0_i32_0 : i32, i32
  }
  func.func @transform_3(%arg0: i32) -> (i32, i32) {
    %c0_i32 = arith.constant 0 : i32
    %c0_i32_0 = arith.constant 0 : i32
    %c0_i32_1 = arith.constant 0 : i32
    return %c0_i32, %c0_i32_0 : i32, i32
  }
  func.func @transform_4(%arg0: i32) -> (i32, i32) {
    %c0_i32 = arith.constant 0 : i32
    %c0_i32_0 = arith.constant 0 : i32
    %c0_i32_1 = arith.constant 0 : i32
    return %c0_i32, %c0_i32_0 : i32, i32
  }
  func.func @transform_5(%arg0: i32) -> (i32, i32) {
    %c0_i32 = arith.constant 0 : i32
    %c0_i32_0 = arith.constant 0 : i32
    %c0_i32_1 = arith.constant 0 : i32
    return %c0_i32, %c0_i32_0 : i32, i32
  }
  func.func @transform_6(%arg0: i32) -> (i32, i32) {
    %c0_i32 = arith.constant 0 : i32
    %c0_i32_0 = arith.constant 0 : i32
    %c0_i32_1 = arith.constant 0 : i32
    return %c0_i32, %c0_i32_0 : i32, i32
  }
  func.func @transform_7(%arg0: i32) -> (i32, i32) {
    %c0_i32 = arith.constant 0 : i32
    %c0_i32_0 = arith.constant 0 : i32
    %c0_i32_1 = arith.constant 0 : i32
    return %c0_i32, %c0_i32_0 : i32, i32
  }
  func.func @transform_8(%arg0: i32) -> (i32, i32) {
    %c0_i32 = arith.constant 0 : i32
    %c0_i32_0 = arith.constant 0 : i32
    %c0_i32_1 = arith.constant 0 : i32
    return %c0_i32, %c0_i32_0 : i32, i32
  }
  func.func @transform_9(%arg0: i32) -> (i32, i32) {
    %c0_i32 = arith.constant 0 : i32
    %c0_i32_0 = arith.constant 0 : i32
    %c0_i32_1 = arith.constant 0 : i32
    return %c0_i32, %c0_i32_0 : i32, i32
  }
  func.func @transform_10(%arg0: i32) -> (i32, i32) {
    %c0_i32 = arith.constant 0 : i32
    %c0_i32_0 = arith.constant 0 : i32
    %c0_i32_1 = arith.constant 0 : i32
    return %c0_i32, %c0_i32_0 : i32, i32
  }
  func.func @transform_11(%arg0: i32) -> (i32, i32) {
    %c0_i32 = arith.constant 0 : i32
    %c0_i32_0 = arith.constant 0 : i32
    %c0_i32_1 = arith.constant 0 : i32
    return %c0_i32, %c0_i32_0 : i32, i32
  }
  func.func @transform_12(%arg0: i32) -> (i32, i32) {
    %c0_i32 = arith.constant 0 : i32
    %c0_i32_0 = arith.constant 0 : i32
    %c0_i32_1 = arith.constant 0 : i32
    return %c0_i32, %c0_i32_0 : i32, i32
  }
  func.func @transform_13(%arg0: i32) -> (i32, i32) {
    %c0_i32 = arith.constant 0 : i32
    %c0_i32_0 = arith.constant 0 : i32
    return %arg0, %c0_i32 : i32, i32
  }
  func.func @transform_14(%arg0: i32) -> (i32, i32) {
    %c0_i32 = arith.constant 0 : i32
    %c0_i32_0 = arith.constant 0 : i32
    return %arg0, %c0_i32 : i32, i32
  }
}

</mosaic_0001>

<bundles_post_ra>
// kernel: tpu_custom_call.1
= control target key start
LH: loop header
LB: loop body
LE: loop exit
PB: predicated region body
PF: predicated region fallthrough
CT: control target
= control target key end

     0   :  { %20 = vsyncpa [#allocation3], 0  ;;  %s1553_s0 = inlined_call_operand.hbm [shape: bf16[8,16], index: 0, kind: input, shape index: {}]   ;;  %s1554_s1 = inlined_call_operand.hbm [shape: bf16[16,128], index: 1, kind: input, shape index: {}]   ;;  %s1555_s2 = inlined_call_operand.vmem [shape: f32[1,128], index: 2, kind: input, shape index: {}]   ;;  %s1556_s3 = inlined_call_operand.hbm [shape: bf16[128,128], index: 3, kind: input, shape index: {}]   ;;  %s1557_s4 = inlined_call_operand.vmem [shape: f32[1,128], index: 4, kind: input, shape index: {}]   ;;  %s1558_s5 = inlined_call_operand.hbm [shape: bf16[128,128], index: 5, kind: input, shape index: {}]   ;;  %s1559_s6 = inlined_call_operand.vmem [shape: f32[1,128], index: 6, kind: input, shape index: {}]   ;;  %s1560_s7 = inlined_call_operand.hbm [shape: bf16[128,128], index: 7, kind: input, shape index: {}]   ;;  %s1561_s8 = inlined_call_operand.vmem [shape: f32[1,128], index: 8, kind: input, shape index: {}]   ;;  %s1562_s9 = inlined_call_operand.hbm [shape: bf16[128,128], index: 9, kind: input, shape index: {}]   ;;  %s1563_s10 = inlined_call_operand.vmem [shape: f32[1,128], index: 10, kind: input, shape index: {}]   ;;  %s1564_s11 = inlined_call_operand.hbm [shape: bf16[128,128], index: 11, kind: input, shape index: {}]   ;;  %s1565_s12 = inlined_call_operand.vmem [shape: f32[1,128], index: 12, kind: input, shape index: {}]   ;;  %s1566_s13 = inlined_call_operand.hbm [shape: f32[8,16], index: 13, kind: output, shape index: {0}]   ;;  %s1567_s14 = inlined_call_operand.hbm [shape: f32[8,8], index: 14, kind: output, shape index: {1}]  }
   0x1   :  { %21 = vsyncpa [#allocation6], 0 }
   0x2   :  { %22 = vsyncpa [#allocation9], 0 }
   0x3   :  { %23 = vsyncpa [#allocation12], 0 }
   0x4   :  { %24 = vsyncpa [#allocation4], 0 }
   0x5   :  { %25 = vsyncpa [#allocation16], 0  ;;  %s1266_s29 = smov [#allocation5]   ;;  %s1056_s17 = scalar_lea.hbm %s1554_s1, 128 }
   0x6   :  { %s41_s30 = sshll.u32 %s1266_s29, 4  ;;  %p1057_p0 = scmp.ne.s32.totalorder %s1554_s1, %s1056_s17  ;;  %s42_s30 = int_to_ptr.vmem [resolvable:$true] %s41_s30 }
   0x7   :  { %p1060_p1 = scmp.lt.u32.totalorder %s1056_s17, %s1554_s1 }
   0x9   :  { %p1062_p2 = pnand %p1060_p1, %p1057_p0 }
   0xb   :  { %1065 = shalt.err (!%p1062_p2)
}
   0xc   :  { %s1066_s22 = scalar_lea.vmem %s42_s30, 128  ;;  %p1071_p4 = scmp.lt.s32.totalorder %s42_s30, %s42_s30 }
   0xd   :  { %p1067_p3 = scmp.ne.s32.totalorder %s42_s30, %s1066_s22  ;;  %p1072_p5 = scmp.lt.s32.totalorder %s1066_s22, %s1066_s22 }
   0xf   :  { %p1073_p6 = por %p1072_p5, %p1071_p4 }
  0x11   :  { %p1074_p7 = pnand %p1073_p6, %p1067_p3 }
  0x13   :  { %1077 = shalt.err (!%p1074_p7)
}
  0x14   :  { %s1267_s23 = smov 64   ;;  %s1268_s24 = smov 4  }
  0x15   :  { %47 = dma.hbm_to_vmem [thread:$0]  %s1554_s1, 128, %s42_s30, [#allocation6], %s1267_s23, %s1267_s23, %s1268_s24  }
  0x16   :  { %s1269_s27 = smov [#allocation8]   ;;  %s1270_s29 = smov [#allocation11]  }
  0x17   :  { %s69_s28 = sshll.u32 %s1269_s27, 4  ;;  %s97_s15 = sshll.u32 %s1270_s29, 4  ;;  %s70_s28 = int_to_ptr.vmem [resolvable:$true] %s69_s28  ;;  %s98_s15 = int_to_ptr.vmem [resolvable:$true] %s97_s15 }
  0x18   :  { %s1078_s18 = scalar_lea.hbm %s1558_s5, 1024 }
  0x19   :  { %p1079_p8 = scmp.ne.s32.totalorder %s1558_s5, %s1078_s18  ;;  %p1082_p9 = scmp.lt.u32.totalorder %s1078_s18, %s1558_s5 }
  0x1b   :  { %p1084_p10 = pnand %p1082_p9, %p1079_p8 }
  0x1d   :  { %1087 = shalt.err (!%p1084_p10)
}
  0x1e   :  { %s1088_s1 = scalar_lea.vmem %s70_s28, 1024  ;;  %p1093_p12 = scmp.lt.s32.totalorder %s70_s28, %s70_s28 }
  0x1f   :  { %p1089_p11 = scmp.ne.s32.totalorder %s70_s28, %s1088_s1  ;;  %p1094_p13 = scmp.lt.s32.totalorder %s1088_s1, %s1088_s1 }
  0x21   :  { %p1095_p0 = por %p1094_p13, %p1093_p12 }
  0x23   :  { %p1096_p1 = pnand %p1095_p0, %p1089_p11 }
  0x25   :  { %1099 = shalt.err (!%p1096_p1)
}
  0x26   :  { %75 = dma.hbm_to_vmem [thread:$0]  %s1558_s5, 1024, %s70_s28, [#allocation9], %s1267_s23, %s1267_s23, %s1268_s24  }
  0x27   :  { %s1100_s29 = scalar_lea.hbm %s1562_s9, 1024 }
  0x28   :  { %p1101_p2 = scmp.ne.s32.totalorder %s1562_s9, %s1100_s29  ;;  %p1104_p3 = scmp.lt.u32.totalorder %s1100_s29, %s1562_s9 }
  0x2a   :  { %p1106_p4 = pnand %p1104_p3, %p1101_p2 }
  0x2c   :  { %1109 = shalt.err (!%p1106_p4)
}
  0x2d   :  { %s1110_s20 = scalar_lea.vmem %s98_s15, 1024  ;;  %p1115_p6 = scmp.lt.s32.totalorder %s98_s15, %s98_s15 }
  0x2e   :  { %p1111_p5 = scmp.ne.s32.totalorder %s98_s15, %s1110_s20  ;;  %p1116_p7 = scmp.lt.s32.totalorder %s1110_s20, %s1110_s20 }
  0x30   :  { %p1117_p8 = por %p1116_p7, %p1115_p6 }
  0x32   :  { %p1118_p9 = pnand %p1117_p8, %p1111_p5 }
  0x34   :  { %1121 = shalt.err (!%p1118_p9)
}
  0x35   :  { %103 = dma.hbm_to_vmem [thread:$0]  %s1562_s9, 1024, %s98_s15, [#allocation12], %s1267_s23, %s1267_s23, %s1268_s24  }
  0x36   :  { %s1271_s21 = smov [#allocation2]   ;;  %s1272_s1 = smov [#allocation7]  }
  0x37   :  { %s32_s22 = sshll.u32 %s1271_s21, 4  ;;  %s55_s30 = sshll.u32 %s1272_s1, 4  ;;  %s33_s22 = int_to_ptr.vmem [resolvable:$true] %s32_s22  ;;  %s56_s30 = int_to_ptr.vmem [resolvable:$true] %s55_s30 }
  0x38   :  { %s1122_s27 = scalar_lea.hbm %s1553_s0, 64 }
  0x39   :  { %p1123_p10 = scmp.ne.s32.totalorder %s1553_s0, %s1122_s27  ;;  %p1126_p11 = scmp.lt.u32.totalorder %s1122_s27, %s1553_s0 }
  0x3b   :  { %p1128_p12 = pnand %p1126_p11, %p1123_p10 }
  0x3d   :  { %1131 = shalt.err (!%p1128_p12)
}
  0x3e   :  { %s1132_s9 = scalar_lea.vmem %s33_s22, 64  ;;  %p1137_p0 = scmp.lt.s32.totalorder %s33_s22, %s33_s22 }
  0x3f   :  { %p1133_p13 = scmp.ne.s32.totalorder %s33_s22, %s1132_s9  ;;  %p1138_p1 = scmp.lt.s32.totalorder %s1132_s9, %s1132_s9 }
  0x41   :  { %p1139_p2 = por %p1138_p1, %p1137_p0 }
  0x43   :  { %p1140_p3 = pnand %p1139_p2, %p1133_p13 }
  0x45   :  { %1143 = shalt.err (!%p1140_p3)
}
  0x46   :  { %35 = dma.hbm_to_vmem [thread:$0]  %s1553_s0, 64, %s33_s22, [#allocation3]  }
  0x47   :  { %s1144_s28 = scalar_lea.hbm %s1556_s3, 1024 }
  0x48   :  { %p1145_p4 = scmp.ne.s32.totalorder %s1556_s3, %s1144_s28  ;;  %p1148_p5 = scmp.lt.u32.totalorder %s1144_s28, %s1556_s3 }
  0x4a   :  { %p1150_p6 = pnand %p1148_p5, %p1145_p4 }
  0x4c   :  { %1153 = shalt.err (!%p1150_p6)
}
  0x4d   :  { %s1154_s27 = scalar_lea.vmem %s56_s30, 1024  ;;  %p1159_p8 = scmp.lt.s32.totalorder %s56_s30, %s56_s30 }
  0x4e   :  { %p1155_p7 = scmp.ne.s32.totalorder %s56_s30, %s1154_s27  ;;  %p1160_p9 = scmp.lt.s32.totalorder %s1154_s27, %s1154_s27 }
  0x50   :  { %p1161_p10 = por %p1160_p9, %p1159_p8 }
  0x52   :  { %p1162_p11 = pnand %p1161_p10, %p1155_p7 }
  0x54   :  { %1165 = shalt.err (!%p1162_p11)
}
  0x55   :  { %61 = dma.hbm_to_vmem [thread:$0]  %s1556_s3, 1024, %s56_s30, [#allocation6], %s1267_s23, %s1267_s23, %s1268_s24  }
  0x56   :  { %s1273_s29 = smov [#allocation10]   ;;  %s1274_s17 = smov [#allocation13]  }
  0x57   :  { %s83_s16 = sshll.u32 %s1273_s29, 4  ;;  %s111_s18 = sshll.u32 %s1274_s17, 4  ;;  %s84_s16 = int_to_ptr.vmem [resolvable:$true] %s83_s16  ;;  %s112_s18 = int_to_ptr.vmem [resolvable:$true] %s111_s18 }
  0x58   :  { %s1166_s19 = scalar_lea.hbm %s1560_s7, 1024 }
  0x59   :  { %p1167_p12 = scmp.ne.s32.totalorder %s1560_s7, %s1166_s19  ;;  %p1170_p13 = scmp.lt.u32.totalorder %s1166_s19, %s1560_s7 }
  0x5b   :  { %p1172_p0 = pnand %p1170_p13, %p1167_p12 }
  0x5d   :  { %1175 = shalt.err (!%p1172_p0)
}
  0x5e   :  { %s1176_s3 = scalar_lea.vmem %s84_s16, 1024  ;;  %p1181_p2 = scmp.lt.s32.totalorder %s84_s16, %s84_s16 }
  0x5f   :  { %p1177_p1 = scmp.ne.s32.totalorder %s84_s16, %s1176_s3  ;;  %p1182_p3 = scmp.lt.s32.totalorder %s1176_s3, %s1176_s3 }
  0x61   :  { %p1183_p4 = por %p1182_p3, %p1181_p2 }
  0x63   :  { %p1184_p5 = pnand %p1183_p4, %p1177_p1 }
  0x65   :  { %1187 = shalt.err (!%p1184_p5)
}
  0x66   :  { %89 = dma.hbm_to_vmem [thread:$0]  %s1560_s7, 1024, %s84_s16, [#allocation9], %s1267_s23, %s1267_s23, %s1268_s24  }
  0x67   :  { %s1188_s27 = scalar_lea.hbm %s1564_s11, 1024 }
  0x68   :  { %p1189_p6 = scmp.ne.s32.totalorder %s1564_s11, %s1188_s27  ;;  %p1192_p7 = scmp.lt.u32.totalorder %s1188_s27, %s1564_s11 }
  0x6a   :  { %p1194_p8 = pnand %p1192_p7, %p1189_p6 }
  0x6c   :  { %1197 = shalt.err (!%p1194_p8)
}
  0x6d   :  { %s1198_s9 = scalar_lea.vmem %s112_s18, 1024  ;;  %p1203_p10 = scmp.lt.s32.totalorder %s112_s18, %s112_s18 }
  0x6e   :  { %p1199_p9 = scmp.ne.s32.totalorder %s112_s18, %s1198_s9  ;;  %p1204_p11 = scmp.lt.s32.totalorder %s1198_s9, %s1198_s9 }
  0x70   :  { %p1205_p12 = por %p1204_p11, %p1203_p10 }
  0x72   :  { %p1206_p13 = pnand %p1205_p12, %p1199_p9 }
  0x74   :  { %1209 = shalt.err (!%p1206_p13)
}
  0x75   :  { %117 = dma.hbm_to_vmem [thread:$0]  %s1564_s11, 1024, %s112_s18, [#allocation12], %s1267_s23, %s1267_s23, %s1268_s24  }
  0x76   :  { %1254 = dma.done.wait [#allocation3], 64  }
  0x77   :  { %1255 = vsyncadd [#allocation3], 4294967232 }
  0x78   :  { %1256 = dma.done.wait [#allocation6], 1152  }
  0x79   :  { %1257 = vsyncadd [#allocation6], 4294966144 }
  0x7a   :  { %1258 = dma.done.wait [#allocation9], 2048  }
  0x7b   :  { %1259 = vsyncadd [#allocation9], 4294965248 }
  0x7c   :  { %1260 = dma.done.wait [#allocation12], 2048  }
  0x7d   :  { %1261 = vsyncadd [#allocation12], 4294965248  ;;  %v1275_v0 = vmov 0.0   ;;  %vm1276_vm0 = vmmov 0   ;;  %v1015_v1 = vld [vmem:[#allocation5] sm:$0xff]   ;;  %vm158_vm1 = vcmask 130048  }
  0x7e   :  { %896 = vmatprep.subr.bf16.mxu0 %v1275_v0  ;;  %898 = vmatprep.mubr.msk.bf16.mxu0 %vm1276_vm0, %v1275_v0  ;;  %v142_v2 = vld [vmem:[#allocation2] sm:$0xf]  ;;  %v1016_v3 = vld [vmem:[#allocation7] sm:$0xff]   ;;  %v1017_v4 = vld [vmem:[#allocation7 + $0x8] sm:$0xff]   ;;  %vm767_vm2 = vcmask 64512  }
  0x7f   :  { %902 = vmatprep.subr.bf16.mxu1 %v1275_v0  ;;  %918 = vmatprep.mubr.msk.bf16.mxu1 %vm1276_vm0, %v1275_v0  ;;  %v1018_v5 = vld [vmem:[#allocation7 + $0x10] sm:$0xff]   ;;  %v1019_v6 = vld [vmem:[#allocation7 + $0x18] sm:$0xff]   ;;  %v1020_v7 = vld [vmem:[#allocation7 + $0x20] sm:$0xff]  }
  0x80   :  { %897 = vmatpush3.bf16.msra.mxu0 %v1015_v1  ;;  %903 = vmatpush3.bf16.msra.mxu1 %v1016_v3  ;;  %v1021_v8 = vld [vmem:[#allocation7 + $0x28] sm:$0xff]   ;;  %v1022_v9 = vld [vmem:[#allocation7 + $0x30] sm:$0xff]   ;;  %v1023_v10 = vld [vmem:[#allocation7 + $0x38] sm:$0xff]  }
  0x81   :  { %922 = vmatprep.subr.bf16.mxu0 %v1275_v0  ;;  %904 = vmatprep.subr.bf16.mxu1 %v1275_v0  ;;  %v1024_v11 = vld [vmem:[#allocation8] sm:$0xff]   ;;  %v1025_v12 = vld [vmem:[#allocation8 + $0x8] sm:$0xff]   ;;  %v1026_v13 = vld [vmem:[#allocation8 + $0x10] sm:$0xff]  }
  0x82   :  { %v1027_v14 = vld [vmem:[#allocation8 + $0x18] sm:$0xff]   ;;  %v1028_v15 = vld [vmem:[#allocation8 + $0x20] sm:$0xff]   ;;  %v1029_v16 = vld [vmem:[#allocation8 + $0x28] sm:$0xff]  }
  0x83   :  { %899 = vmatmul.mubr.msk.bf16.vlgmr.msra.gmra.mrb[0].mxu0 %vm158_vm1, %v142_v2  ;;  %v801_v17 = vld [vmem:[%s1555_s2] ss:$0 sm:$0xff]  ;;  %v1031_v26 = vld [vmem:[#allocation8 + $0x38] sm:$0xff]   ;;  %v1032_v27 = vld [vmem:[#allocation10] sm:$0xff]  }
  0x84   :  { %938 = vmatprep.mubr.msk.bf16.mxu0 %vm1276_vm0, %v1275_v0  ;;  %905 = vmatpush3.bf16.msra.mxu1 %v1017_v4  ;;  %v1030_v25 = vld [vmem:[#allocation8 + $0x30] sm:$0xff]   ;;  %v1033_v28 = vld [vmem:[#allocation10 + $0x8] sm:$0xff]   ;;  %v1035_v30 = vld [vmem:[#allocation10 + $0x18] sm:$0xff]  }
  0x85   :  { %906 = vmatprep.subr.bf16.mxu1 %v1275_v0  ;;  %923 = vmatpush3.bf16.msra.mxu0 %v1024_v11  ;;  %v1034_v29 = vld [vmem:[#allocation10 + $0x10] sm:$0xff]   ;;  %v1036_v31 = vld [vmem:[#allocation10 + $0x20] sm:$0xff]   ;;  %v1037_v32 = vld [vmem:[#allocation10 + $0x28] sm:$0xff]  }
  0x86   :  { %924 = vmatprep.subr.bf16.mxu0 %v1275_v0  ;;  %v1038_v33 = vld [vmem:[#allocation10 + $0x30] sm:$0xff]   ;;  %v1039_v42 = vld [vmem:[#allocation10 + $0x38] sm:$0xff]   ;;  %v1040_v43 = vld [vmem:[#allocation11] sm:$0xff]  }
  0x87   :  { %v804_v34 = vld [vmem:[%s1557_s4] ss:$0 sm:$0xff]  ;;  %v1041_v44 = vld [vmem:[#allocation11 + $0x8] sm:$0xff]   ;;  %v1043_v46 = vld [vmem:[#allocation11 + $0x18] sm:$0xff]  }
  0x88   :  { %907 = vmatpush3.bf16.msra.mxu1 %v1018_v5  ;;  %v1042_v45 = vld [vmem:[#allocation11 + $0x10] sm:$0xff]   ;;  %v1044_v47 = vld [vmem:[#allocation11 + $0x20] sm:$0xff]   ;;  %v1045_v48 = vld [vmem:[#allocation11 + $0x28] sm:$0xff]  }
  0x89   :  { %908 = vmatprep.subr.bf16.mxu1 %v1275_v0  ;;  %925 = vmatpush3.bf16.msra.mxu0 %v1025_v12  ;;  %v813_v49 = vld [vmem:[%s1559_s6] ss:$0 sm:$0xff]  ;;  %v1047_v57 = vld [vmem:[#allocation11 + $0x38] sm:$0xff]   ;;  %v1048_v58 = vld [vmem:[#allocation13] sm:$0xff]  }
  0x8a   :  { %926 = vmatprep.subr.bf16.mxu0 %v1275_v0  ;;  %v1046_v56 = vld [vmem:[#allocation11 + $0x30] sm:$0xff]   ;;  %v1049_v59 = vld [vmem:[#allocation13 + $0x8] sm:$0xff]   ;;  %v1051_v61 = vld [vmem:[#allocation13 + $0x18] sm:$0xff]  }
  0x8b   :  { %v1050_v60 = vld [vmem:[#allocation13 + $0x10] sm:$0xff]   ;;  %v1052_v62 = vld [vmem:[#allocation13 + $0x20] sm:$0xff]   ;;  %v1053_v63 = vld [vmem:[#allocation13 + $0x28] sm:$0xff]  }
  0x8c   :  { %909 = vmatpush3.bf16.msra.mxu1 %v1019_v6  ;;  %v822_v1 = vld [vmem:[%s1561_s8] ss:$0 sm:$0xff]  ;;  %s1277_s8 = smov [#allocation15]  }
  0x8d   :  { %910 = vmatprep.subr.bf16.mxu1 %v1275_v0  ;;  %927 = vmatpush3.bf16.msra.mxu0 %v1026_v13  ;;  %v831_v11 = vld [vmem:[%s1563_s10] ss:$0 sm:$0xff]  ;;  %s785_s5 = sshll.u32 %s1277_s8, 4  ;;  %s786_s5 = int_to_ptr.vmem [resolvable:$true] %s785_s5 }
  0x8e   :  { %928 = vmatprep.subr.bf16.mxu0 %v1275_v0  ;;  %s1210_s28 = scalar_lea.vmem %s786_s5, 128  ;;  %p1215_p1 = scmp.lt.s32.totalorder %s786_s5, %s786_s5 }
  0x8f   :  { %p1211_p0 = scmp.ne.s32.totalorder %s786_s5, %s1210_s28  ;;  %p1216_p2 = scmp.lt.s32.totalorder %s1210_s28, %s1210_s28 }
  0x90   :  { %911 = vmatpush3.bf16.msra.mxu1 %v1020_v7 }
  0x91   :  { %912 = vmatprep.subr.bf16.mxu1 %v1275_v0  ;;  %929 = vmatpush3.bf16.msra.mxu0 %v1027_v14  ;;  %p1217_p3 = por %p1216_p2, %p1215_p1 }
  0x92   :  { %930 = vmatprep.subr.bf16.mxu0 %v1275_v0 }
  0x93   :  { %p1218_p4 = pnand %p1217_p3, %p1211_p0 }
  0x94   :  { %913 = vmatpush3.bf16.msra.mxu1 %v1021_v8 }
  0x95   :  { %914 = vmatprep.subr.bf16.mxu1 %v1275_v0  ;;  %931 = vmatpush3.bf16.msra.mxu0 %v1028_v15 }
  0x96   :  { %932 = vmatprep.subr.bf16.mxu0 %v1275_v0 }
  0x98   :  { %915 = vmatpush3.bf16.msra.mxu1 %v1022_v9  ;;  %v1054_v9 = vld [vmem:[#allocation13 + $0x30] sm:$0xff]  }
  0x99   :  { %916 = vmatprep.subr.bf16.mxu1 %v1275_v0  ;;  %933 = vmatpush3.bf16.msra.mxu0 %v1029_v16 }
  0x9a   :  { %934 = vmatprep.subr.bf16.mxu0 %v1275_v0 }
  0x9c   :  { %917 = vmatpush3.bf16.msra.mxu1 %v1023_v10  ;;  %v1055_v10 = vld [vmem:[#allocation13 + $0x38] sm:$0xff]  }
  0x9d   :  { %942 = vmatprep.subr.bf16.mxu1 %v1275_v0  ;;  %935 = vmatpush3.bf16.msra.mxu0 %v1030_v25 }
  0x9e   :  { %936 = vmatprep.subr.bf16.mxu0 %v1275_v0 }
  0xa1   :  { %937 = vmatpush3.bf16.msra.mxu0 %v1031_v26 }
  0xa2   :  { %962 = vmatprep.subr.bf16.mxu0 %v1275_v0 }
 0x156   :  { %v196_v18 = vpop.f32.mrb[0].mxu0 }
 0x157   :  { %v197_v19 = vadd.f32 %v801_v17, %v196_v18  ;;  %v900_v20 = vpop.f32.mrb[1].mxu0 }
 0x158   :  { %v199_v21 = vpop.f32.mrb[2].mxu0 }
 0x159   :  { %v202_v22 = vmax.f32 %v197_v19, 0.0  ;;  %v901_v23 = vpop.f32.mrb[3].mxu0 }
 0x15b   :  { %v203_v24 = vpack.c.bf16 %v202_v22, %v202_v22 }
 0x15d   :  { %919 = vmatmul.mubr.bf16.vlgmr.msra.gmra.mrb[0].mxu1 %v203_v24 }
 0x15e   :  { %958 = vmatprep.mubr.msk.bf16.mxu1 %vm1276_vm0, %v1275_v0  ;;  %943 = vmatpush3.bf16.msra.mxu1 %v1032_v27 }
 0x15f   :  { %944 = vmatprep.subr.bf16.mxu1 %v1275_v0 }
 0x162   :  { %945 = vmatpush3.bf16.msra.mxu1 %v1033_v28 }
 0x163   :  { %946 = vmatprep.subr.bf16.mxu1 %v1275_v0 }
 0x166   :  { %947 = vmatpush3.bf16.msra.mxu1 %v1034_v29 }
 0x167   :  { %948 = vmatprep.subr.bf16.mxu1 %v1275_v0 }
 0x16a   :  { %949 = vmatpush3.bf16.msra.mxu1 %v1035_v30 }
 0x16b   :  { %950 = vmatprep.subr.bf16.mxu1 %v1275_v0 }
 0x16e   :  { %951 = vmatpush3.bf16.msra.mxu1 %v1036_v31 }
 0x16f   :  { %952 = vmatprep.subr.bf16.mxu1 %v1275_v0 }
 0x172   :  { %953 = vmatpush3.bf16.msra.mxu1 %v1037_v32 }
 0x173   :  { %954 = vmatprep.subr.bf16.mxu1 %v1275_v0 }
 0x176   :  { %955 = vmatpush3.bf16.msra.mxu1 %v1038_v33 }
 0x177   :  { %956 = vmatprep.subr.bf16.mxu1 %v1275_v0 }
 0x17a   :  { %957 = vmatpush3.bf16.msra.mxu1 %v1039_v42 }
 0x17b   :  { %982 = vmatprep.subr.bf16.mxu1 %v1275_v0 }
 0x230   :  { %v309_v35 = vpop.f32.mrb[0].mxu1 }
 0x231   :  { %v310_v36 = vadd.f32 %v804_v34, %v309_v35  ;;  %v920_v37 = vpop.f32.mrb[1].mxu1 }
 0x232   :  { %v312_v38 = vpop.f32.mrb[2].mxu1 }
 0x233   :  { %v315_v39 = vmax.f32 %v310_v36, 0.0  ;;  %v921_v40 = vpop.f32.mrb[3].mxu1 }
 0x235   :  { %v316_v41 = vpack.c.bf16 %v315_v39, %v315_v39 }
 0x237   :  { %939 = vmatmul.mubr.bf16.vlgmr.msra.gmra.mrb[4].mxu0 %v316_v41 }
 0x238   :  { %978 = vmatprep.mubr.msk.bf16.mxu0 %vm1276_vm0, %v1275_v0  ;;  %963 = vmatpush3.bf16.msra.mxu0 %v1040_v43 }
 0x239   :  { %964 = vmatprep.subr.bf16.mxu0 %v1275_v0 }
 0x23c   :  { %965 = vmatpush3.bf16.msra.mxu0 %v1041_v44 }
 0x23d   :  { %966 = vmatprep.subr.bf16.mxu0 %v1275_v0 }
 0x240   :  { %967 = vmatpush3.bf16.msra.mxu0 %v1042_v45 }
 0x241   :  { %968 = vmatprep.subr.bf16.mxu0 %v1275_v0 }
 0x244   :  { %969 = vmatpush3.bf16.msra.mxu0 %v1043_v46 }
 0x245   :  { %970 = vmatprep.subr.bf16.mxu0 %v1275_v0 }
 0x248   :  { %971 = vmatpush3.bf16.msra.mxu0 %v1044_v47 }
 0x249   :  { %972 = vmatprep.subr.bf16.mxu0 %v1275_v0 }
 0x24c   :  { %973 = vmatpush3.bf16.msra.mxu0 %v1045_v48 }
 0x24d   :  { %974 = vmatprep.subr.bf16.mxu0 %v1275_v0 }
 0x250   :  { %975 = vmatpush3.bf16.msra.mxu0 %v1046_v56 }
 0x251   :  { %976 = vmatprep.subr.bf16.mxu0 %v1275_v0 }
 0x254   :  { %977 = vmatpush3.bf16.msra.mxu0 %v1047_v57 }
 0x30a   :  { %v422_v50 = vpop.f32.mrb[4].mxu0 }
 0x30b   :  { %v423_v51 = vadd.f32 %v813_v49, %v422_v50  ;;  %v940_v52 = vpop.f32.mrb[5].mxu0 }
 0x30c   :  { %v425_v53 = vpop.f32.mrb[6].mxu0 }
 0x30d   :  { %v428_v54 = vpack.c.bf16 %v423_v51, %v423_v51  ;;  %v941_v55 = vpop.f32.mrb[7].mxu0  ;;  %768 = vst.msk [vmem:[#allocation15] sm:$0xff] %vm767_vm2, %v423_v51 }
 0x30f   :  { %959 = vmatmul.mubr.bf16.vlgmr.msra.gmra.mrb[4].mxu1 %v428_v54 }
 0x310   :  { %998 = vmatprep.mubr.msk.bf16.mxu1 %vm1276_vm0, %v1275_v0  ;;  %983 = vmatpush3.bf16.msra.mxu1 %v1048_v58 }
 0x311   :  { %984 = vmatprep.subr.bf16.mxu1 %v1275_v0 }
 0x314   :  { %985 = vmatpush3.bf16.msra.mxu1 %v1049_v59 }
 0x315   :  { %986 = vmatprep.subr.bf16.mxu1 %v1275_v0 }
 0x318   :  { %987 = vmatpush3.bf16.msra.mxu1 %v1050_v60 }
 0x319   :  { %988 = vmatprep.subr.bf16.mxu1 %v1275_v0 }
 0x31c   :  { %989 = vmatpush3.bf16.msra.mxu1 %v1051_v61 }
 0x31d   :  { %990 = vmatprep.subr.bf16.mxu1 %v1275_v0 }
 0x320   :  { %991 = vmatpush3.bf16.msra.mxu1 %v1052_v62 }
 0x321   :  { %992 = vmatprep.subr.bf16.mxu1 %v1275_v0 }
 0x324   :  { %993 = vmatpush3.bf16.msra.mxu1 %v1053_v63 }
 0x325   :  { %994 = vmatprep.subr.bf16.mxu1 %v1275_v0 }
 0x328   :  { %995 = vmatpush3.bf16.msra.mxu1 %v1054_v9 }
 0x329   :  { %996 = vmatprep.subr.bf16.mxu1 %v1275_v0 }
 0x32c   :  { %997 = vmatpush3.bf16.msra.mxu1 %v1055_v10 }
 0x3e2   :  { %v534_v2 = vpop.f32.mrb[4].mxu1 }
 0x3e3   :  { %v535_v3 = vadd.f32 %v822_v1, %v534_v2  ;;  %v960_v4 = vpop.f32.mrb[5].mxu1 }
 0x3e4   :  { %v537_v5 = vpop.f32.mrb[6].mxu1 }
 0x3e5   :  { %v540_v6 = vmax.f32 %v535_v3, 0.0  ;;  %v961_v7 = vpop.f32.mrb[7].mxu1 }
 0x3e7   :  { %v541_v8 = vpack.c.bf16 %v540_v6, %v540_v6 }
 0x3e9   :  { %979 = vmatmul.mubr.bf16.vlgmr.msra.gmra.mrb[8].mxu0 %v541_v8 }
 0x4bc   :  { %v647_v12 = vpop.f32.mrb[8].mxu0 }
 0x4bd   :  { %v648_v13 = vadd.f32 %v831_v11, %v647_v12  ;;  %v980_v14 = vpop.f32.mrb[9].mxu0 }
 0x4be   :  { %v650_v15 = vpop.f32.mrb[10].mxu0 }
 0x4bf   :  { %v653_v16 = vmax.f32 %v648_v13, 0.0  ;;  %v981_v17 = vpop.f32.mrb[11].mxu0 }
 0x4c1   :  { %v654_v18 = vpack.c.bf16 %v653_v16, %v653_v16 }
 0x4c3   :  { %999 = vmatmul.mubr.bf16.vlgmr.msra.gmra.mrb[8].mxu1 %v654_v18 }
 0x4c4   :  { %1221 = shalt.err (!%p1218_p4)
}
 0x4c5   :  { %s1222_s3 = scalar_lea.hbm %s1567_s14, 128 }
 0x4c6   :  { %p1223_p5 = scmp.ne.s32.totalorder %s1567_s14, %s1222_s3  ;;  %p1226_p6 = scmp.lt.u32.totalorder %s1222_s3, %s1567_s14 }
 0x4c8   :  { %p1228_p7 = pnand %p1226_p6, %p1223_p5 }
 0x4ca   :  { %1231 = shalt.err (!%p1228_p7)
}
 0x4cb   :  { %788 = dma.vmem_to_hbm [thread:$0]  %s786_s5, 128, %s1567_s14, [#allocation16]   ;;  %v840_v0 = vld [vmem:[%s1565_s12] ss:$0 sm:$0xff] }
 0x4cc   :  { %s1278_s17 = smov [#allocation14]  }
 0x4cd   :  { %s775_s9 = sshll.u32 %s1278_s17, 4  ;;  %s776_s9 = int_to_ptr.vmem [resolvable:$true] %s775_s9 }
 0x4ce   :  { %s1232_s7 = scalar_lea.vmem %s776_s9, 128  ;;  %p1237_p9 = scmp.lt.s32.totalorder %s776_s9, %s776_s9 }
 0x4cf   :  { %p1233_p8 = scmp.ne.s32.totalorder %s776_s9, %s1232_s7  ;;  %p1238_p10 = scmp.lt.s32.totalorder %s1232_s7, %s1232_s7 }
 0x4d1   :  { %p1239_p11 = por %p1238_p10, %p1237_p9 }
 0x4d3   :  { %p1240_p12 = pnand %p1239_p11, %p1233_p8 }
 0x596   :  { %v760_v19 = vpop.f32.mrb[8].mxu1 }
 0x597   :  { %v761_v20 = vadd.f32 %v840_v0, %v760_v19  ;;  %v1000_v21 = vpop.f32.mrb[9].mxu1 }
 0x598   :  { %v763_v22 = vpop.f32.mrb[10].mxu1 }
 0x599   :  { %766 = vst.msk [vmem:[#allocation14] sm:$0xff] %vm158_vm1, %v761_v20  ;;  %v1001_v23 = vpop.f32.mrb[11].mxu1 }
 0x59a   :  { %1243 = shalt.err (!%p1240_p12)
}
 0x59b   :  { %s1244_s12 = scalar_lea.hbm %s1566_s13, 128 }
 0x59c   :  { %p1245_p13 = scmp.ne.s32.totalorder %s1566_s13, %s1244_s12  ;;  %p1248_p0 = scmp.lt.u32.totalorder %s1244_s12, %s1566_s13 }
 0x59e   :  { %p1250_p1 = pnand %p1248_p0, %p1245_p13 }
 0x5a0   :  { %1253 = shalt.err (!%p1250_p1)
}
 0x5a1   :  { %778 = dma.vmem_to_hbm [thread:$0]  %s776_s9, 128, %s1566_s13, [#allocation4]  }
 0x5a2   :  { %1262 = dma.done.wait [#allocation4], 128  }
 0x5a3   :  { %1263 = vsyncadd [#allocation4], 4294967168 }
 0x5a4   :  { %1264 = dma.done.wait [#allocation16], 128  }
 0x5a5   :  { %1265 = vsyncadd [#allocation16], 4294967168 }
 0x5a6   :  { %795 = vsyncpa [#allocation3], 1 }
 0x5a7   :  { %796 = vsyncpa [#allocation6], 1 }
 0x5a8   :  { %797 = vsyncpa [#allocation9], 1 }
 0x5a9   :  { %798 = vsyncpa [#allocation12], 1 }
 0x5aa   :  { %799 = vsyncpa [#allocation4], 1 }
 0x5ab   :  { %800 = vsyncpa [#allocation16], 1 }

</bundles_post_ra>
